<compile_context>
chip_gen: v6e
topology: v6e:2x2x1
jax: 0.10.0
libtpu: 0.0.40
codegen_flags: <defaults>
</compile_context>

<pallas_src>
import jax
import jax.numpy as jnp
from jax.experimental import pallas as pl
from jax.experimental.pallas import tpu as pltpu


def _marker_weight_kernel(x_ref, w_ref, o_ref):
    # x_ref: (tb, tmd); w_ref: (1, tmd) -> broadcasts along the sublane axis.
    o_ref[...] = x_ref[...] * w_ref[...]


def _round_up(a: int, b: int) -> int:
    return ((a + b - 1) // b) * b


def _tpu_plan():
    """Per-generation tiling knobs.

    Returns (target_block_bytes, vmem_budget_bytes, vmem_limit_bytes_or_None,
    num_tensorcores). Falls back to conservative values if the device kind
    cannot be identified (correctness is unaffected).
    """
    kind = ""
    try:
        kind = jax.devices()[0].device_kind.lower()
    except Exception:
        pass
    if "v5 lite" in kind or "v5e" in kind or "v5litepod" in kind:
        # 16 MiB scoped-VMEM default; ~2 MiB blocks are already ~5 us of DMA.
        return 2 << 20, 14 << 20, None, 1
    if "v6" in kind:
        # 32 MiB scoped default; 4 MiB blocks halve the per-step overhead share.
        return 4 << 20, 28 << 20, None, 1
    if "7x" in kind or "v7" in kind:
        # 64 MiB physical VMEM, 2 TensorCores, 3.2 TB/s HBM: go big and raise
        # the scoped limit explicitly (default is 32 MiB).
        return 8 << 20, 44 << 20, 48 << 20, 2
    # Unknown generation: settings that are safe everywhere.
    return 2 << 20, 14 << 20, None, 1


def marker_weight_forward(x: jax.Array, weight: jax.Array,
                          *, min_pallas_bytes: int = 256 * 1024) -> jax.Array:
    """y = x * weight[None], x: (B, M, D), weight: (M, D)."""
    B, M, D = x.shape
    assert weight.shape == (M, D)
    weight = weight.astype(x.dtype)          # keep output dtype == x.dtype
    itemsize = jnp.dtype(x.dtype).itemsize
    MD = M * D
    total_bytes = B * MD * itemsize

    # Tiny-input fast path: let XLA fuse the broadcast multiply into neighbors.
    if total_bytes < min_pallas_bytes:
        return x * weight[None, :, :]

    target_bytes, vmem_budget, vmem_limit, num_tc = _tpu_plan()

    # Native sublane packing: 8 rows (32-bit), 16 (16-bit), 32 (8-bit dtypes).
    sub = max(8, 32 // itemsize)

    # Largest per-block byte size keeping double-buffered x + y inside the
    # scoped-VMEM budget: 2 arrays * 2 buffers * block <= budget.
    max_block_bytes = min(target_bytes, vmem_budget // 4)

    row_bytes = MD * itemsize
    if sub * row_bytes > max_block_bytes:
        # Huge M*D edge case: also tile the lane dimension, in multiples of 128.
        tmd = max(128, ((max_block_bytes // (sub * itemsize)) // 128) * 128)
        tmd = min(tmd, MD)
        tb = min(B, sub)
    else:
        tmd = MD
        rows = max_block_bytes // row_bytes
        tb = min(B, max(sub, (rows // sub) * sub))

    # v7x has 2 TensorCores: for large inputs make sure the "parallel" batch
    # axis has at least num_tc grid steps so both cores get work.
    if num_tc > 1 and total_bytes >= (2 << 20) and B > sub:
        tb = min(tb, max(sub, _round_up(pl.cdiv(B, num_tc), sub)))

    grid = (pl.cdiv(B, tb), pl.cdiv(MD, tmd))

    grid_spec = pltpu.PrefetchScalarGridSpec(
        num_scalar_prefetch=0,
        grid=grid,
        in_specs=[
            pl.BlockSpec((tb, tmd), lambda i, j: (i, j)),   # batch-tiled x slab
            pl.BlockSpec((1, tmd), lambda i, j: (0, j)),    # weight row (resident)
        ],
        out_specs=pl.BlockSpec((tb, tmd), lambda i, j: (i, j)),
    )

    y2 = pl.pallas_call(
        _marker_weight_kernel,
        out_shape=jax.ShapeDtypeStruct((B, MD), x.dtype),
        grid_spec=grid_spec,
        compiler_params=pltpu.CompilerParams(
            dimension_semantics=("parallel", "parallel"),
            vmem_limit_bytes=vmem_limit,
        ),
    )(x.reshape(B, MD), weight.reshape(1, MD))

    return y2.reshape(B, M, D)


if __name__ == "__main__":
    marker_dim = 20
    output_dim = 16
    batch = 2

    k0, k1, k2 = jax.random.split(jax.random.PRNGKey(0), 3)
    x = jax.random.normal(k0, (batch, marker_dim, output_dim), dtype=jnp.float32)
    # Deterministic parameter init, matching torch.ones(marker_dim, output_dim).
    weight = jnp.ones((marker_dim, output_dim), dtype=jnp.float32)

    # Force the Pallas path even though this demo input is tiny (the default
    # wrapper behavior would take the XLA fast path below ~256 KiB).
    y = marker_weight_forward(x, weight, min_pallas_bytes=0)
    y = jax.block_until_ready(y)
    y_ref = x * weight[None, :, :]
    assert y.shape == (batch, marker_dim, output_dim)
    assert jnp.allclose(y, y_ref, atol=1e-6, rtol=1e-6)

    # Also exercise the multi-block tiling path (several grid steps over the
    # batch axis) with a non-trivial weight.
    big_b = 4096
    xb = jax.random.normal(k1, (big_b, marker_dim, output_dim), dtype=jnp.float32)
    wb = jax.random.normal(k2, (marker_dim, output_dim), dtype=jnp.float32)
    yb = jax.block_until_ready(marker_weight_forward(xb, wb))
    assert jnp.allclose(yb, xb * wb[None, :, :], atol=1e-6, rtol=1e-6)

    print("KERNEL_OK")
</pallas_src>

<mosaic_0001>
module attributes {stable_mosaic.version = 11 : i64} {
  func.func @_marker_weight_kernel(%arg0: i32, %arg1: i32, %arg2: memref<2x320xf32, #tpu.memory_space<vmem>>, %arg3: memref<1x320xf32, #tpu.memory_space<vmem>>, %arg4: memref<2x320xf32, #tpu.memory_space<vmem>>) attributes {dimension_semantics = [#tpu.dimension_semantics<parallel>, #tpu.dimension_semantics<parallel>], iteration_bounds = array<i64: 1, 1>, scalar_prefetch = 0 : i64, scratch_operands = 0 : i64, tpu.core_type = #tpu.core_type<tc>, window_params = [{transform_indices = @transform_0, window_bounds = array<i64: 2, 320>}, {transform_indices = @transform_1, window_bounds = array<i64: 1, 320>}, {transform_indices = @transform_2, window_bounds = array<i64: 2, 320>}]} {
    %c0 = arith.constant 0 : index
    %c0_0 = arith.constant 0 : index
    %0 = vector.load %arg2[%c0, %c0_0] : memref<2x320xf32, #tpu.memory_space<vmem>>, vector<2x320xf32>
    %c0_1 = arith.constant 0 : index
    %c0_2 = arith.constant 0 : index
    %1 = vector.load %arg3[%c0_1, %c0_2] : memref<1x320xf32, #tpu.memory_space<vmem>>, vector<1x320xf32>
    %2 = vector.broadcast %1 : vector<1x320xf32> to vector<2x320xf32>
    %3 = arith.mulf %0, %2 : vector<2x320xf32>
    %c0_3 = arith.constant 0 : index
    %c0_4 = arith.constant 0 : index
    %4 = vector.load %arg4[%c0_3, %c0_4] : memref<2x320xf32, #tpu.memory_space<vmem>>, vector<2x320xf32>
    tpu.vector_store %arg4[%c0_3, %c0_4], %3 {strides = array<i32>} : memref<2x320xf32, #tpu.memory_space<vmem>>, vector<2x320xf32>,
    return
  }
  func.func @transform_0(%arg0: i32, %arg1: i32) -> (i32, i32) {
    %c0_i32 = arith.constant 0 : i32
    return %arg0, %arg1 : i32, i32
  }
  func.func @transform_1(%arg0: i32, %arg1: i32) -> (i32, i32) {
    %c0_i32 = arith.constant 0 : i32
    %c0_i32_0 = arith.constant 0 : i32
    return %c0_i32, %arg1 : i32, i32
  }
  func.func @transform_2(%arg0: i32, %arg1: i32) -> (i32, i32) {
    %c0_i32 = arith.constant 0 : i32
    return %arg0, %arg1 : i32, i32
  }
}

</mosaic_0001>

<bundles_post_ra>
// kernel: tpu_custom_call.1
= control target key start
LH: loop header
LB: loop body
LE: loop exit
PB: predicated region body
PF: predicated region fallthrough
CT: control target
= control target key end

     0   :  { %7 = vsyncpa [#allocation3], 0  ;;  %s189_s0 = inlined_call_operand.hbm [shape: f32[2,320], index: 0, kind: input, shape index: {}]   ;;  %s190_s1 = inlined_call_operand.hbm [shape: f32[1,320], index: 1, kind: input, shape index: {}]   ;;  %s191_s2 = inlined_call_operand.hbm [shape: f32[2,320], index: 2, kind: output, shape index: {}]  }
   0x1   :  { %8 = vsyncpa [#allocation6], 0 }
   0x2   :  { %9 = vsyncpa [#allocation4], 0  ;;  %s161_s9 = smov [#allocation2]   ;;  %s162_s11 = smov [#allocation5]  }
   0x3   :  { %s16_s10 = sshll.u32 %s161_s9, 4  ;;  %s26_s12 = sshll.u32 %s162_s11, 4  ;;  %s17_s10 = int_to_ptr.vmem [resolvable:$true] %s16_s10  ;;  %s27_s12 = int_to_ptr.vmem [resolvable:$true] %s26_s12 }
   0x4   :  { %s103_s13 = scalar_lea.vmem %s17_s10, 96  ;;  %p108_p1 = scmp.lt.s32.totalorder %s17_s10, %s17_s10 }
   0x5   :  { %p104_p0 = scmp.ne.s32.totalorder %s17_s10, %s103_s13  ;;  %p109_p2 = scmp.lt.s32.totalorder %s103_s13, %s103_s13 }
   0x7   :  { %p110_p3 = por %p109_p2, %p108_p1 }
   0x9   :  { %p111_p4 = pnand %p110_p3, %p104_p0 }
   0xb   :  { %114 = shalt.err (!%p111_p4)
}
   0xc   :  { %19 = dma.hbm_to_vmem [thread:$0]  %s189_s0, 96, %s17_s10, [#allocation3]  }
   0xd   :  { %s123_s16 = scalar_lea.vmem %s27_s12, 48  ;;  %s127_s17 = scalar_lea.vmem %s27_s12, 64 }
   0xe   :  { %p124_p5 = scmp.ne.s32.totalorder %s27_s12, %s123_s16  ;;  %p128_p6 = scmp.lt.s32.totalorder %s27_s12, %s27_s12 }
   0xf   :  { %p129_p7 = scmp.lt.s32.totalorder %s127_s17, %s123_s16 }
  0x11   :  { %p130_p8 = por %p129_p7, %p128_p6 }
  0x13   :  { %p131_p9 = pnand %p130_p8, %p124_p5 }
  0x15   :  { %134 = shalt.err (!%p131_p9)
}
  0x16   :  { %29 = dma.hbm_to_vmem [thread:$0]  %s190_s1, 48, %s27_s12, [#allocation6]  }
  0x17   :  { %155 = dma.done.wait [#allocation3], 96  }
  0x18   :  { %156 = vsyncadd [#allocation3], 4294967200 }
  0x19   :  { %157 = dma.done.wait [#allocation6], 48  }
  0x1a   :  { %158 = vsyncadd [#allocation6], 4294967248  ;;  %v39_v0 = vlaneseq  ;;  %v163_v1 = vmov 1983009808   ;;  %v37_v9 = vld [vmem:[#allocation5] sm:$0x7] }
  0x1b   :  { %v53_v2 = vunpack.c.l.s4 %v163_v1  ;;  %vm69_vm0 = vcmask 1041408   ;;  %vm70_vm1 = vcmask 1043458   ;;  %vm72_vm3 = vcmask 521220   ;;  %v36_v16 = vld [vmem:[#allocation2] sm:$0x3f]  ;;  %s164_s0 = smov [#allocation7]  }
  0x1c   :  { %v40_v3 = vshrl.u32 %v39_v0, 7  ;;  %vm71_vm2 = vmor %vm70_vm1, %vm69_vm0  ;;  %s81_s1 = sshll.u32 %s164_s0, 4  ;;  %s82_s1 = int_to_ptr.vmem [resolvable:$true] %s81_s1 }
  0x1d   :  { %v54_v4 = vunpack.c.0.s8 %v53_v2  ;;  %vm73_vm4 = vmor %vm72_vm3, %vm71_vm2  ;;  %s135_s20 = scalar_lea.vmem %s82_s1, 96  ;;  %p140_p11 = scmp.lt.s32.totalorder %s82_s1, %s82_s1 }
  0x1e   :  { %v41_v5 = vsub.s32 0, %v40_v3  ;;  %v45_v6 = vsub.s32 1, %v40_v3  ;;  %v49_v7 = vsub.s32 2, %v40_v3  ;;  %p136_p10 = scmp.ne.s32.totalorder %s82_s1, %s135_s20  ;;  %p141_p12 = scmp.lt.s32.totalorder %s135_s20, %s135_s20 }
  0x1f   :  { %v57_v8 = vsub.s32 %v54_v4, %v40_v3 }
  0x20   :  { %v42_v10 = vrot.slane %v37_v9, %v41_v5  ;;  %v46_v11 = vrot.slane %v37_v9, %v45_v6  ;;  %v50_v12 = vrot.slane %v37_v9, %v49_v7  ;;  %p142_p13 = por %p141_p12, %p140_p11 }
  0x22   :  { %v51_v13 = vcombine.low %v42_v10, %v46_v11  ;;  %v65_v14 = vrot.slane %v50_v12, %v57_v8  ;;  %p143_p0 = pnand %p142_p13, %p136_p10 }
  0x24   :  { %v58_v15 = vrot.slane %v51_v13, %v57_v8 }
  0x26   :  { %v66_v17 = vcombine.low %v58_v15, %v65_v14 }
  0x28   :  { %v68_v18 = vmul.f32 %v66_v17, %v36_v16 }
  0x2a   :  { %74 = vst.msk [vmem:[#allocation7] sm:$0x3f] %vm73_vm4, %v68_v18 }
  0x2b   :  { %146 = shalt.err (!%p143_p0)
}
  0x2c   :  { %84 = dma.vmem_to_hbm [thread:$0]  %s82_s1, 96, %s191_s2, [#allocation4]  }
  0x2d   :  { %159 = dma.done.wait [#allocation4], 96  }
  0x2e   :  { %160 = vsyncadd [#allocation4], 4294967200 }
  0x2f   :  { %88 = vsyncpa [#allocation3], 1 }
  0x30   :  { %89 = vsyncpa [#allocation6], 1 }
  0x31   :  { %90 = vsyncpa [#allocation4], 1 }

</bundles_post_ra>
